<compile_context>
chip_gen: v7x
topology: tpu7x:2x2x1
jax: 0.10.0
libtpu: 0.0.40
codegen_flags: <defaults>
</compile_context>

<pallas_src>
import jax
import jax.numpy as jnp
from jax import lax
from jax.experimental import pallas as pl
from jax.experimental.pallas import tpu as pltpu

_NEG = -1e30                     # plain Python float: finite "-inf", exp underflows to 0
_PACK = 128                      # lane-dense packed output width
_VMEM_LIMIT = 48 * 1024 * 1024   # safe on v5e/v6e (128 MiB) and v7x (64 MiB physical)


# --------------------------------------------------------------------------- #
# Pre-pass: per node tile, embedding + degree + normalized GCN input           #
# --------------------------------------------------------------------------- #
def _dwr_pre_kernel(x_ref, a_ref, we_ref, be_ref, wg_ref,
                    h_out_ref, y_out_ref, dinv_out_ref):
    f32 = jnp.float32
    h = jnp.dot(x_ref[...], we_ref[...], preferred_element_type=f32) + be_ref[...]
    h = jnp.maximum(h, 0.0)                                   # [TM, H]
    a = a_ref[...]                                            # [TM, N] bf16 exact 0/1
    # self loop folded analytically: deg = rowsum(A) + 1
    deg = jnp.sum((a != 0).astype(f32), axis=1, keepdims=True) + 1.0
    dinv = lax.rsqrt(deg)                                     # [TM, 1]
    xlin = jnp.dot(h, wg_ref[...], preferred_element_type=f32)
    h_out_ref[...] = h
    y_out_ref[...] = dinv * xlin                              # y = D^-1/2 (h @ Wg)
    dinv_out_ref[...] = dinv


# --------------------------------------------------------------------------- #
# Main kernel: per node tile, edge softmax + GCN aggregation + output head     #
# --------------------------------------------------------------------------- #
def _dwr_main_kernel(a_ref, tcol_ref, dinv_ref, h_t_ref, y_t_ref,
                     h_all_ref, y_all_ref, tz_ref,
                     bg_ref, wo1r_ref, wo1t_ref, wo1z_ref, bo1_ref,
                     packw_ref, packz_ref, packb_ref,
                     packed_ref):
    f32 = jnp.float32
    bf16 = jnp.bfloat16

    a = a_ref[...]                                            # [TM, N] bf16, exact 0/1
    edge = a != 0
    h_t = h_t_ref[...]                                        # [TM, H] f32
    t_col = tcol_ref[...]                                     # [TM, 1]

    # ---- edge attention scores: S[i, j] = <h_i, h_j> (bf16 MXU, f32 acc) ----
    s = lax.dot_general(h_t.astype(bf16), h_all_ref[...].astype(bf16),
                        (((1,), (1,)), ((), ())), preferred_element_type=f32)
    # Mask BEFORE the exp (finite large-negative -> exp underflows to exactly 0).
    # Per-row max shift (softmax is row-shift invariant); clamp at 0 is safe
    # because h is post-ReLU so every real edge score is >= 0 (handles empty rows).
    s = jnp.where(edge, s, _NEG)
    m = jnp.maximum(jnp.max(s, axis=1, keepdims=True), 0.0)
    e = jnp.exp(s - m)                                        # [TM, N], non-edges -> 0

    # ---- z numerator & denominator in ONE MXU matmul against [t | 1 | 0...] ----
    ez = jnp.dot(e.astype(bf16), tz_ref[...], preferred_element_type=f32)  # [TM, 128]
    z = ez[:, 0:1] / (ez[:, 1:2] + 1e-8)                      # [TM, 1]

    # ---- GCNConv: symmetric normalization with analytic self loop ----
    # (A + I) @ y == A @ y + y ; dinv / y were produced by the pre-pass
    agg = jnp.dot(a, y_all_ref[...].astype(bf16), preferred_element_type=f32) \
        + y_t_ref[...]
    g = dinv_ref[...] * agg + bg_ref[...]
    rep = h_t + jnp.maximum(g, 0.0)                           # [TM, H]

    # ---- output head: Linear(cat([rep, t, z])) -> ReLU -> Linear (fused) ----
    f1 = (jnp.dot(rep, wo1r_ref[...], preferred_element_type=f32)
          + t_col * wo1t_ref[...] + z * wo1z_ref[...] + bo1_ref[...])
    f1 = jnp.maximum(f1, 0.0)                                 # [TM, H]

    # Lane-dense packed output [TM, 128] = [rep | out | z | 0-pad]; the final
    # Linear (wo2, bo2) is folded into packw / packb -> one fused pack matmul
    # and one unmasked full-width store.
    cat = jnp.concatenate([rep, f1], axis=1)                  # [TM, 2H]
    packed = (jnp.dot(cat, packw_ref[...], preferred_element_type=f32)
              + z * packz_ref[...] + packb_ref[...])
    packed_ref[...] = packed


# --------------------------------------------------------------------------- #
# Wrapper                                                                      #
# --------------------------------------------------------------------------- #
def _pick_tm(n, tm_max=512):
    if n <= tm_max:
        return n
    best = None
    for d in range(8, tm_max + 1, 8):
        if n % d == 0:
            best = d
    return best if best is not None else n


def dwr_forward(x, A, t, params, *, tm=None):
    f32 = jnp.float32
    bf16 = jnp.bfloat16
    N, n_in = x.shape
    n_hemb = params["we_t"].shape[1]
    n_hgcn = params["wg_t"].shape[1]
    n_out = params["wo2_t"].shape[1]
    assert n_hemb == n_hgcn, "rep = h + relu(gcn(h)) requires n_hemb == n_hgcn"
    assert n_hemb + n_out + 1 <= _PACK

    if tm is None:
        tm = _pick_tm(N)
    assert N % tm == 0 and (tm == N or tm % 8 == 0)
    grid = (N // tm,)

    # Host-side preprocessing (glue): exact 0/1 adjacency structure in bf16
    # (halves the dominant HBM stream; zeros stay exact so `a != 0` is correct).
    a_struct = (A != 0).astype(bf16)
    x = x.astype(f32)
    t_col = t.reshape(N, 1).astype(f32)

    # [t | 1 | 0...] slab for the single-matmul z numerator/denominator.
    tz = jnp.zeros((N, _PACK), f32)
    tz = tz.at[:, 0].set(t.astype(f32)).at[:, 1].set(1.0).astype(bf16)

    # Packing projection (scatters [rep | out | z] into 128 lanes); the model's
    # final Linear (wo2 / bo2) is folded in here.
    pack_w = jnp.zeros((2 * n_hemb, _PACK), f32)
    pack_w = pack_w.at[:n_hemb, :n_hemb].set(jnp.eye(n_hemb, dtype=f32))
    pack_w = pack_w.at[n_hemb:, n_hemb:n_hemb + n_out].set(params["wo2_t"])
    pack_z = jnp.zeros((1, _PACK), f32).at[0, n_hemb + n_out].set(1.0)
    pack_b = jnp.zeros((1, _PACK), f32).at[:, n_hemb:n_hemb + n_out].set(params["bo2"])

    def row_spec(width):
        return pl.BlockSpec((tm, width), lambda i: (i, 0))

    def full_spec(shape):
        nd = len(shape)
        return pl.BlockSpec(shape, lambda i, _nd=nd: (0,) * _nd)

    cparams = pltpu.CompilerParams(dimension_semantics=("parallel",),
                                   vmem_limit_bytes=_VMEM_LIMIT)

    # ---- pre-pass: h, y = D^-1/2 (h @ Wg), dinv (row-tiled, streams A once) ----
    h, y, dinv = pl.pallas_call(
        _dwr_pre_kernel,
        grid=grid,
        in_specs=[row_spec(n_in), row_spec(N),
                  full_spec(params["we_t"].shape), full_spec(params["be"].shape),
                  full_spec(params["wg_t"].shape)],
        out_specs=[row_spec(n_hemb), row_spec(n_hgcn), row_spec(1)],
        out_shape=[jax.ShapeDtypeStruct((N, n_hemb), f32),
                   jax.ShapeDtypeStruct((N, n_hgcn), f32),
                   jax.ShapeDtypeStruct((N, 1), f32)],
        compiler_params=cparams,
    )(x, a_struct, params["we_t"], params["be"], params["wg_t"])

    # ---- main kernel: edge softmax + GCN aggregation + output head ----
    packed = pl.pallas_call(
        _dwr_main_kernel,
        grid=grid,
        in_specs=[row_spec(N),                 # A tile (bf16, streamed)
                  row_spec(1),                 # t tile
                  row_spec(1),                 # dinv tile
                  row_spec(n_hemb),            # h tile
                  row_spec(n_hgcn),            # y tile
                  full_spec((N, n_hemb)),      # h (full, resident)
                  full_spec((N, n_hgcn)),      # y (full, resident)
                  full_spec((N, _PACK)),       # [t | 1] slab (bf16, resident)
                  full_spec(params["bg"].shape),
                  full_spec(params["wo1_rep_t"].shape),
                  full_spec(params["wo1_t"].shape),
                  full_spec(params["wo1_z"].shape),
                  full_spec(params["bo1"].shape),
                  full_spec(pack_w.shape),
                  full_spec(pack_z.shape),
                  full_spec(pack_b.shape)],
        out_specs=pl.BlockSpec((tm, _PACK), lambda i: (i, 0)),
        out_shape=jax.ShapeDtypeStruct((N, _PACK), f32),
        compiler_params=cparams,
        cost_estimate=pl.CostEstimate(
            flops=2 * N * N * (n_hemb + n_hgcn + _PACK),
            transcendentals=N * N,
            bytes_accessed=2 * N * N + 4 * N * _PACK),
    )(a_struct, t_col, dinv, h, y, h, y, tz,
      params["bg"], params["wo1_rep_t"], params["wo1_t"], params["wo1_z"],
      params["bo1"], pack_w, pack_z, pack_b)

    rep = packed[:, :n_hemb]
    out = packed[:, n_hemb:n_hemb + n_out]
    z = packed[:, n_hemb + n_out]
    return out, rep, z


# --------------------------------------------------------------------------- #
# Pure-JAX reference (mirrors the PyTorch semantics for symmetric A)           #
# --------------------------------------------------------------------------- #
def dwr_reference(x, A, t, params):
    P = lax.Precision.HIGHEST
    x = x.astype(jnp.float32)
    A = A.astype(jnp.float32)
    t_col = t.reshape(-1, 1).astype(jnp.float32)
    N = A.shape[0]

    h = jnp.maximum(jnp.dot(x, params["we_t"], precision=P) + params["be"], 0.0)
    mask = A != 0.0
    s = jnp.dot(h, h.T, precision=P)
    m = jnp.max(jnp.where(mask, s, -jnp.inf))
    e = jnp.where(mask, jnp.exp(s - m), 0.0)
    deno = e.sum(1, keepdims=True) + 1e-8
    att = e / deno
    z = jnp.dot(att, t_col, precision=P)

    M = jnp.where(jnp.eye(N, dtype=bool), 1.0, mask.astype(jnp.float32))
    A_tilde = M.T
    deg = A_tilde.sum(1, keepdims=True)
    dinv = lax.rsqrt(deg)
    xlin = jnp.dot(h, params["wg_t"], precision=P)
    g = dinv * jnp.dot(A_tilde, dinv * xlin, precision=P) + params["bg"]
    rep = h + jnp.maximum(g, 0.0)

    f1 = jnp.maximum(jnp.dot(rep, params["wo1_rep_t"], precision=P)
                     + t_col * params["wo1_t"] + z * params["wo1_z"] + params["bo1"], 0.0)
    out = jnp.dot(f1, params["wo2_t"], precision=P) + params["bo2"]
    return out, rep, z[:, 0]


if __name__ == "__main__":
    N, n_in, n_hemb, n_hgcn, n_out = 16, 8, 32, 32, 1

    key = jax.random.PRNGKey(0)
    keys = jax.random.split(key, 13)

    x = jax.random.normal(keys[0], (N, n_in), jnp.float32)
    r = jax.random.bernoulli(keys[1], 0.3, (N, N))
    # symmetric adjacency, no self loops (typical graph for this model).
    # TODO(synk): torch_sparse set_value(layout=None) on the transposed tensor
    # permutes values for asymmetric A; dense form here matches the symmetric case.
    A = jnp.logical_and(jnp.logical_or(r, r.T), ~jnp.eye(N, dtype=bool)).astype(jnp.float32)
    t = jax.random.uniform(keys[2], (N,), jnp.float32)

    def glorot(k, shape):
        fan_in, fan_out = shape
        lim = (6.0 / (fan_in + fan_out)) ** 0.5
        return jax.random.uniform(k, shape, jnp.float32, -lim, lim)

    params = {
        # emb: Linear(n_in, n_hemb)           -> weight^T [n_in, n_hemb], bias [1, n_hemb]
        "we_t": glorot(keys[3], (n_in, n_hemb)),
        "be": 0.1 * jax.random.normal(keys[4], (1, n_hemb), jnp.float32),
        # gcn: GCNConv(n_hemb, n_hgcn)        -> lin weight^T [n_hemb, n_hgcn], bias [1, n_hgcn]
        "wg_t": glorot(keys[5], (n_hemb, n_hgcn)),
        "bg": 0.1 * jax.random.normal(keys[6], (1, n_hgcn), jnp.float32),
        # out[0]: Linear(n_hgcn + 2, n_hemb)  -> split into [rep | t | z] column blocks
        "wo1_rep_t": glorot(keys[7], (n_hgcn, n_hemb)),
        "wo1_t": glorot(keys[8], (1, n_hemb)),
        "wo1_z": glorot(keys[9], (1, n_hemb)),
        "bo1": 0.1 * jax.random.normal(keys[10], (1, n_hemb), jnp.float32),
        # out[2]: Linear(n_hemb, n_out)       (folded into the packing projection)
        "wo2_t": glorot(keys[11], (n_out and (n_hemb, n_out))),
        "bo2": 0.1 * jax.random.normal(keys[12], (1, n_out), jnp.float32),
    }

    # tm=8 -> 2-step row-tiled grid, exercising the pipelined/tiled path at toy size.
    out, rep, z = dwr_forward(x, A, t, params, tm=8)
    jax.block_until_ready((out, rep, z))

    ro, rr, rz = dwr_reference(x, A, t, params)
    assert out.shape == (N, n_out) and rep.shape == (N, n_hemb) and z.shape == (N,)
    # bf16 MXU operands (A, h, e, y) with f32 accumulation -> mixed-precision tolerance.
    assert jnp.allclose(out, ro, atol=3e-2, rtol=3e-2)
    assert jnp.allclose(rep, rr, atol=3e-2, rtol=3e-2)
    assert jnp.allclose(z, rz, atol=3e-2, rtol=3e-2)

    print("KERNEL_OK")
</pallas_src>

<mosaic_0001>
module attributes {stable_mosaic.version = 11 : i64} {
  func.func @_dwr_pre_kernel(%arg0: i32, %arg1: memref<8x8xf32, #tpu.memory_space<vmem>>, %arg2: memref<8x16xbf16, #tpu.memory_space<vmem>>, %arg3: memref<8x32xf32, #tpu.memory_space<vmem>>, %arg4: memref<1x32xf32, #tpu.memory_space<vmem>>, %arg5: memref<32x32xf32, #tpu.memory_space<vmem>>, %arg6: memref<8x32xf32, #tpu.memory_space<vmem>>, %arg7: memref<8x32xf32, #tpu.memory_space<vmem>>, %arg8: memref<8x1xf32, #tpu.memory_space<vmem>>) attributes {dimension_semantics = [#tpu.dimension_semantics<parallel>], iteration_bounds = array<i64: 2>, scalar_prefetch = 0 : i64, scratch_operands = 0 : i64, tpu.core_type = #tpu.core_type<tc>, window_params = [{transform_indices = @transform_0, window_bounds = array<i64: 8, 8>}, {transform_indices = @transform_1, window_bounds = array<i64: 8, 16>}, {pipeline_mode = #tpu.pipeline_mode<synchronous>, transform_indices = @transform_2, window_bounds = array<i64: 8, 32>}, {pipeline_mode = #tpu.pipeline_mode<synchronous>, transform_indices = @transform_3, window_bounds = array<i64: 1, 32>}, {pipeline_mode = #tpu.pipeline_mode<synchronous>, transform_indices = @transform_4, window_bounds = array<i64: 32, 32>}, {transform_indices = @transform_5, window_bounds = array<i64: 8, 32>}, {transform_indices = @transform_6, window_bounds = array<i64: 8, 32>}, {transform_indices = @transform_7, window_bounds = array<i64: 8, 1>}]} {
    %c0 = arith.constant 0 : index
    %c0_0 = arith.constant 0 : index
    %0 = vector.load %arg1[%c0, %c0_0] : memref<8x8xf32, #tpu.memory_space<vmem>>, vector<8x8xf32>
    %c0_1 = arith.constant 0 : index
    %c0_2 = arith.constant 0 : index
    %1 = vector.load %arg3[%c0_1, %c0_2] : memref<8x32xf32, #tpu.memory_space<vmem>>, vector<8x32xf32>
    %cst = arith.constant dense<0.000000e+00> : vector<8x32xf32>
    %2 = tpu.matmul %0, %1, %cst {dimension_numbers = #tpu.dot_dimension_numbers<[1], [0], [0], [1], [0, 0, 1, 1], [], []>} : vector<8x8xf32>, vector<8x32xf32>, vector<8x32xf32> -> vector<8x32xf32>
    %c0_3 = arith.constant 0 : index
    %c0_4 = arith.constant 0 : index
    %3 = vector.load %arg4[%c0_3, %c0_4] : memref<1x32xf32, #tpu.memory_space<vmem>>, vector<1x32xf32>
    %4 = vector.broadcast %3 : vector<1x32xf32> to vector<8x32xf32>
    %5 = arith.addf %2, %4 : vector<8x32xf32>
    %cst_5 = arith.constant 0.000000e+00 : f32
    %6 = vector.broadcast %cst_5 : f32 to vector<8x32xf32>
    %7 = arith.maximumf %5, %6 : vector<8x32xf32>
    %c0_6 = arith.constant 0 : index
    %c0_7 = arith.constant 0 : index
    %8 = vector.load %arg2[%c0_6, %c0_7] : memref<8x16xbf16, #tpu.memory_space<vmem>>, vector<8x16xbf16>
    %cst_8 = arith.constant 0.000000e+00 : bf16
    %9 = vector.broadcast %cst_8 : bf16 to vector<8x16xbf16>
    %10 = arith.cmpf one, %8, %9 : vector<8x16xbf16>
    %11 = arith.extui %10 : vector<8x16xi1> to vector<8x16xi32>
    %12 = arith.sitofp %11 : vector<8x16xi32> to vector<8x16xf32>
    %cst_9 = arith.constant dense<0.000000e+00> : vector<8xf32>
    %13 = vector.multi_reduction <add>, %12, %cst_9 [1] : vector<8x16xf32> to vector<8xf32>
    %14 = vector.shape_cast %13 : vector<8xf32> to vector<8x1xf32>
    %cst_10 = arith.constant 1.000000e+00 : f32
    %15 = vector.broadcast %cst_10 : f32 to vector<8x1xf32>
    %16 = arith.addf %14, %15 : vector<8x1xf32>
    %17 = math.rsqrt %16 : vector<8x1xf32>
    %c0_11 = arith.constant 0 : index
    %c0_12 = arith.constant 0 : index
    %18 = vector.load %arg5[%c0_11, %c0_12] : memref<32x32xf32, #tpu.memory_space<vmem>>, vector<32x32xf32>
    %cst_13 = arith.constant dense<0.000000e+00> : vector<8x32xf32>
    %19 = tpu.matmul %7, %18, %cst_13 {dimension_numbers = #tpu.dot_dimension_numbers<[1], [0], [0], [1], [0, 0, 1, 1], [], []>} : vector<8x32xf32>, vector<32x32xf32>, vector<8x32xf32> -> vector<8x32xf32>
    %c0_14 = arith.constant 0 : index
    %c0_15 = arith.constant 0 : index
    %20 = vector.load %arg6[%c0_14, %c0_15] : memref<8x32xf32, #tpu.memory_space<vmem>>, vector<8x32xf32>
    tpu.vector_store %arg6[%c0_14, %c0_15], %7 {strides = array<i32>} : memref<8x32xf32, #tpu.memory_space<vmem>>, vector<8x32xf32>,
    %21 = vector.broadcast %17 : vector<8x1xf32> to vector<8x32xf32>
    %22 = arith.mulf %21, %19 : vector<8x32xf32>
    %c0_16 = arith.constant 0 : index
    %c0_17 = arith.constant 0 : index
    %23 = vector.load %arg7[%c0_16, %c0_17] : memref<8x32xf32, #tpu.memory_space<vmem>>, vector<8x32xf32>
    tpu.vector_store %arg7[%c0_16, %c0_17], %22 {strides = array<i32>} : memref<8x32xf32, #tpu.memory_space<vmem>>, vector<8x32xf32>,
    %c0_18 = arith.constant 0 : index
    %c0_19 = arith.constant 0 : index
    %24 = vector.load %arg8[%c0_18, %c0_19] : memref<8x1xf32, #tpu.memory_space<vmem>>, vector<8x1xf32>
    tpu.vector_store %arg8[%c0_18, %c0_19], %17 {strides = array<i32>} : memref<8x1xf32, #tpu.memory_space<vmem>>, vector<8x1xf32>,
    return
  }
  func.func @transform_0(%arg0: i32) -> (i32, i32) {
    %c0_i32 = arith.constant 0 : i32
    %c0_i32_0 = arith.constant 0 : i32
    return %arg0, %c0_i32 : i32, i32
  }
  func.func @transform_1(%arg0: i32) -> (i32, i32) {
    %c0_i32 = arith.constant 0 : i32
    %c0_i32_0 = arith.constant 0 : i32
    return %arg0, %c0_i32 : i32, i32
  }
  func.func @transform_2(%arg0: i32) -> (i32, i32) {
    %c0_i32 = arith.constant 0 : i32
    %c0_i32_0 = arith.constant 0 : i32
    %c0_i32_1 = arith.constant 0 : i32
    return %c0_i32, %c0_i32_0 : i32, i32
  }
  func.func @transform_3(%arg0: i32) -> (i32, i32) {
    %c0_i32 = arith.constant 0 : i32
    %c0_i32_0 = arith.constant 0 : i32
    %c0_i32_1 = arith.constant 0 : i32
    return %c0_i32, %c0_i32_0 : i32, i32
  }
  func.func @transform_4(%arg0: i32) -> (i32, i32) {
    %c0_i32 = arith.constant 0 : i32
    %c0_i32_0 = arith.constant 0 : i32
    %c0_i32_1 = arith.constant 0 : i32
    return %c0_i32, %c0_i32_0 : i32, i32
  }
  func.func @transform_5(%arg0: i32) -> (i32, i32) {
    %c0_i32 = arith.constant 0 : i32
    %c0_i32_0 = arith.constant 0 : i32
    return %arg0, %c0_i32 : i32, i32
  }
  func.func @transform_6(%arg0: i32) -> (i32, i32) {
    %c0_i32 = arith.constant 0 : i32
    %c0_i32_0 = arith.constant 0 : i32
    return %arg0, %c0_i32 : i32, i32
  }
  func.func @transform_7(%arg0: i32) -> (i32, i32) {
    %c0_i32 = arith.constant 0 : i32
    %c0_i32_0 = arith.constant 0 : i32
    return %arg0, %c0_i32 : i32, i32
  }
}

</mosaic_0001>

<bundles_post_ra>
// kernel: tpu_custom_call.1
= control target key start
LH: loop header
LB: loop body
LE: loop exit
PB: predicated region body
PF: predicated region fallthrough
CT: control target
= control target key end

     0   :  { %13 = vsyncpa [#allocation3], 0  ;;  %s1311_s0 = inlined_call_operand.vmem [shape: f32[16,8], index: 0, kind: input, shape index: {}]   ;;  %s1312_s1 = inlined_call_operand.hbm [shape: bf16[16,16], index: 1, kind: input, shape index: {}]   ;;  %s1313_s2 = inlined_call_operand.hbm [shape: f32[8,32], index: 2, kind: input, shape index: {}]   ;;  %s1314_s3 = inlined_call_operand.vmem [shape: f32[1,32], index: 3, kind: input, shape index: {}]   ;;  %s1315_s4 = inlined_call_operand.vmem [shape: f32[32,32], index: 4, kind: input, shape index: {}]   ;;  %s1316_s5 = inlined_call_operand.hbm [shape: f32[16,32], index: 5, kind: output, shape index: {0}]   ;;  %s1317_s6 = inlined_call_operand.hbm [shape: f32[16,32], index: 6, kind: output, shape index: {1}]   ;;  %s1318_s7 = inlined_call_operand.vmem [shape: f32[16,1], index: 7, kind: output, shape index: {2}]  }
   0x1   :  { %15 = vsyncpa [#allocation3 + $0x1], 0 }
   0x2   :  { %16 = vsyncpa [#allocation6], 0 }
   0x3   :  { %17 = vsyncpa [#allocation4], 0 }
   0x4   :  { %19 = vsyncpa [#allocation4 + $0x1], 0 }
   0x5   :  { %20 = vsyncpa [#allocation9], 0 }
   0x6   :  { %22 = vsyncpa [#allocation9 + $0x1], 0  ;;  %s1045_s24 = smov 0   ;;  %s1047_s25 = smov 0  }
   0x7   :  { %s1049_s26 = smov 0   ;;  %s1051_s27 = smov 0  }
   0x8 LB: > { %s1066_s28 = sadd.s32 4294967295, %s995_s27   ;;  %s715_s29 = sadd.s32 4294967294, %s995_s27   ;;  %s995_s27 = sphi %s1051_s27, %s1344_s27   ;;  %s991_s26 = sphi %s1049_s26, %s1343_s26   ;;  %s987_s25 = sphi %s1047_s25, %s1342_s25   ;;  %s983_s24 = sphi %s1045_s24, %s1341_s24  }
   0x9   : > { %p74_p0 = scmp.ne.s32.totalorder %s987_s25, %s983_s24  ;;  %p1319_p1 = scmp.eq.s32.totalorder %s1066_s28, 0 }
   0xa   : > { %p167_p3 = scmp.eq.s32.totalorder %s715_s29, 1  ;;  %p716_p5 = scmp.ge.s32.totalorder %s995_s27, 1 }
   0xb   : > { %p1075_p4 = por %p1319_p1, %p74_p0  ;;  %p226_p7 = scmp.lt.s32.totalorder %s995_s27, 3 }
   0xc   : > { %p1080_p6 = por %p167_p3, %p74_p0  ;;  %s997_s10 = smov [#allocation5]  }
   0xd   : > { %s1323_s30 = scalar_select %p1075_p4, 1, 0 }
   0xe   : > { %s1324_s8 = scalar_select %p1080_p6, 1, 0 }
   0xf   : > { %p1085_p8 = pnand %p716_p5, %p226_p7  ;;  %s239_s11 = sshll.u32 %s997_s10, 4  ;;  %s240_s11 = int_to_ptr.vmem [resolvable:$true] %s239_s11 }
  0x10   : > { %s1093_s12 = sadd.s32 1, %s995_s27   ;;  %s61_s16 = sadd.s32 1, %s991_s26 }
  0x11   : > { %s1325_s9 = scalar_select %p1085_p8, 1, 0 }
  0x12   : > { %p777_p10 = pneg %p1085_p8  ;;  %s58_s14 = ssub.s32 %s995_s27, %s1093_s12 }
  0x13   : > { %p1103_p12 = scmp.eq.s32.totalorder %s58_s14, 0  ;;  %s835_s19 = scalar_lea.hbm %s1313_s2, 128 }
  0x14   : > { %p1097_p11 = pnand %p777_p10, %p1319_p1  ;;  %p836_p0 = scmp.ne.s32.totalorder %s1313_s2, %s835_s19 }
  0x15   : > { %s1327_s15 = scalar_select %p1103_p12, 1, 0 }
  0x16   : > { %p837_p3 = pneg %p1097_p11  ;;  %p842_p10 = scmp.lt.u32.totalorder %s835_s19, %s1313_s2 }
  0x18   : > { %p838_p5 = pnand %p837_p3, %p836_p0 }
  0x1a   : > { %p839_p7 = pneg %p838_p5 }
  0x1c   : > { %p844_p9 = pnand %p842_p10, %p839_p7 }
  0x1e   : > { %847 = shalt.err (!%p844_p9)
}
  0x1f   : > { %s848_s29 = scalar_lea.vmem %s240_s11, 128  ;;  %p856_p6 = scmp.lt.s32.totalorder %s240_s11, %s240_s11 }
  0x20   : > { %p849_p1 = scmp.ne.s32.totalorder %s240_s11, %s848_s29  ;;  %p857_p4 = scmp.lt.s32.totalorder %s848_s29, %s848_s29 }
  0x22   : > { %p851_p2 = pnand %p849_p1, %p837_p3  ;;  %p858_p8 = por %p857_p4, %p856_p6 }
  0x24   : > { %p852_p13 = pneg %p851_p2 }
  0x26   : > { %p859_p12 = pnand %p858_p8, %p852_p13 }
  0x28   : > { %862 = shalt.err (!%p859_p12)
}
  0x29   : > { %780 = dma.hbm_to_vmem [thread:$0]  (!%p1097_p11), %s1313_s2, 128, %s240_s11, [#allocation6]  }
  0x2a   : > { %p1328_p1 = scmp.ne.s32.totalorder %s1327_s15, 0  ;;  %p69_p2 = scmp.eq.s32.totalorder %s995_s27, 0 }
  0x2b   : > { %p1329_p4 = scmp.ne.s32.totalorder %s991_s26, %s987_s25  ;;  %p1330_p6 = scmp.eq.s32.totalorder %s1066_s28, 1 }
  0x2c   : > { %s1129_s17 = scalar_select %p1328_p1, %s991_s26, %s61_s16  }
  0x2d   : > { %p1137_p8 = por %p1330_p6, %p1329_p4  ;;  %p793_p9 = scmp.lt.s32.totalorder %s995_s27, 2 }
  0x2e   : > { %s263_s18 = sand.u32 1, %s991_s26   ;;  %p1332_p12 = pmov %p1329_p4 }
  0x2f   : > { %s719_s19 = sshll.u32 %s263_s18, 2  ;;  %s720_s20 = sshll.u32 %s995_s27, 6 }
  0x30   : > { %p70_p13 = por %p69_p2, %p1332_p12  ;;  %s1150_s11 = scalar_lea.hbm %s1312_s1, %s720_s20 }
  0x31   : > { %s267_s15 = scalar_lea.vmem [#allocation2], %s719_s19  ;;  %s264_s29 = scalar_lea.sflag [#allocation3], %s263_s18 }
  0x32   : > { %s274_s16 = sshll.u32 %s267_s15, 4  ;;  %p1152_p11 = pnand %p793_p9, %p70_p13  ;;  %s1156_s16 = int_to_ptr.vmem [resolvable:$true] %s274_s16 }
  0x33   : > { %s863_s10 = scalar_lea.hbm %s1150_s11, 64  ;;  %s868_s20 = scalar_lea.hbm %s1312_s1, 128 }
  0x34   : > { %p864_p0 = scmp.ne.s32.totalorder %s1150_s11, %s863_s10  ;;  %p865_p3 = pneg %p1152_p11 }
  0x35   : > { %p869_p10 = scmp.lt.u32.totalorder %s1150_s11, %s1312_s1  ;;  %p870_p1 = scmp.lt.u32.totalorder %s868_s20, %s863_s10 }
  0x36   : > { %p866_p5 = pnand %p865_p3, %p864_p0  ;;  %p872_p4 = scmp.lt.u32.totalorder %s863_s10, %s1150_s11 }
  0x37   : > { %p871_p2 = por %p870_p1, %p869_p10 }
  0x38   : > { %p867_p7 = pneg %p866_p5 }
  0x39   : > { %p873_p6 = por %p872_p4, %p871_p2 }
  0x3b   : > { %p874_p9 = pnand %p873_p6, %p867_p7 }
  0x3d   : > { %877 = shalt.err (!%p874_p9)
}
  0x3e   : > { %s878_s18 = scalar_lea.vmem %s1156_s16, 64  ;;  %s998_s15 = smov [#allocation2]  }
  0x3f   : > { %p879_p12 = scmp.ne.s32.totalorder %s1156_s16, %s878_s18  ;;  %s883_s14 = sshll.u32 %s998_s15, 4  ;;  %s884_s14 = int_to_ptr.vmem [resolvable:$false] %s883_s14 }
  0x40   : > { %s885_s19 = scalar_lea.vmem %s884_s14, 128  ;;  %p886_p5 = scmp.lt.s32.totalorder %s1156_s16, %s884_s14 }
  0x41   : > { %p881_p13 = pnand %p879_p12, %p865_p3  ;;  %p887_p10 = scmp.lt.s32.totalorder %s885_s19, %s878_s18 }
  0x43   : > { %p882_p0 = pneg %p881_p13  ;;  %p888_p1 = por %p887_p10, %p886_p5 }
  0x45   : > { %p889_p2 = pnand %p888_p1, %p882_p0 }
  0x47   : > { %892 = shalt.err (!%p889_p2)
}
  0x48   : > { %784 = dma.hbm_to_vmem [thread:$0]  (!%p1152_p11), %s1150_s11, 64, %s1156_s16, %s264_s29  }
  0x49   : > { %p1334_p7 = scmp.ne.s32.totalorder %s1325_s9, 0 }
  0x4a   : > { %s1186_s10 = sand.u32 (!%p1334_p7), 1, %s987_s25   ;;  %p1335_p3 = scmp.ne.s32.totalorder (!%p1334_p7), %s1323_s30, 0 }
  0x4b   : > { %283 = sbr.rel (%p1334_p7) target bundleno = 537 (0x219), region = 40  ;;  %s722_s20 = sshll.u32 (!%p1334_p7), %s1186_s10, 2 }
  0x4c   : > { %s286_s21 = scalar_lea.sflag (!%p1334_p7), [#allocation3], %s1186_s10  ;;  %s289_s22 = scalar_lea.vmem (!%p1334_p7), [#allocation2], %s722_s20 }
  0x52   : > { %966 = dma.done.wait (%p1335_p3), %s286_s21, 64  }
  0x53   : > { %968 = vsyncadd (%p1335_p3), %s286_s21, 4294967232  ;;  %p1336_p4 = scmp.eq.s32.totalorder %s1066_s28, 0 }
  0x55   : > { %970 = dma.done.wait (%p1336_p4), [#allocation6], 128   ;;  %p1337_p11 = pmov %p1336_p4 }
  0x56   : > { %p337_p6 = scmp.lt.s32.totalorder %s1066_s28, 1  ;;  %v999_v0 = vmov 0.0   ;;  %vm1000_vm0 = vmmov 0   ;;  %v1001_v1 = vmov 0.0|0.0   ;;  %vm357_vm1 = vcmask 64512   ;;  %v349_v2 = vld [vmem:[#allocation5] sm:$0xff] }
  0x57   : > { %972 = vsyncadd (%p1337_p11), [#allocation6], 4294967168  ;;  %745 = vmatprep.subr.mxu0 %v999_v0  ;;  %747 = vmatprep.mubr.msk.f32.mxu0 %vm1000_vm0, %v999_v0  ;;  %v445_v4 = vld [vmem:[%s1315_s4] sm:$0xff]  ;;  %v446_v5 = vld [vmem:[%s1315_s4 + $0x8] sm:$0xff]  ;;  %v1002_v11 = vmov 0   ;;  %vm439_vm3 = vcmask 130048  }
  0x58   : > { %s1200_s9 = scalar_select %p337_p6, %s1066_s28, 1  ;;  %761 = vmatprep.subr.bf16.mxu1 %v1001_v1  ;;  %758 = vmatprep.mubr.msk.f32.mxu1 %vm1000_vm0, %v999_v0  ;;  %v762_v6 = vpack.c.bf16 %v446_v5, %v445_v4  ;;  %v447_v7 = vld [vmem:[%s1315_s4 + $0x10] sm:$0xff]  ;;  %v448_v8 = vld [vmem:[%s1315_s4 + $0x18] sm:$0xff]  ;;  %v432_v10 = vld [vmem:[%s289_s22] sm:$0xf]  ;;  %vm449_vm5 = vcmask 261120  }
  0x59   : > { %746 = vmatpush3.msra.mxu0 %v349_v2  ;;  %v765_v9 = vpack.c.bf16 %v448_v8, %v447_v7  ;;  %vm433_vm2 = vcmp.ne.bf16.partialorder %v432_v10, 0  ;;  %v728_v16 = vld [vmem:[%s1314_s3] ss:$0 sm:$0xff]  ;;  %s1322_s29 = sshll.u32 %s1186_s10, 3  ;;  %vm526_vm6 = vcmask 7168   ;;  %s734_s19 = sshll.u32 %s1066_s28, 7 }
  0x5a   : > { %s726_s30 = sshll.u32 %s1200_s9, 3  ;;  %763 = vmatpush3.bf16.msra.mxu1 %v762_v6  ;;  %v434_v12 = vsel %vm433_vm2, 65537, %v1002_v11  ;;  %s323_s22 = scalar_lea.vmem [#allocation7], %s1322_s29 }
  0x5b   : > { %s340_s23 = scalar_lea.vmem %s1311_s0, %s726_s30  ;;  %764 = vmatprep.subr.bf16.mxu1 %v1001_v1  ;;  %v435_v13 = vunpack.c.l.b16 %v434_v12  ;;  %s344_s14 = scalar_lea.vmem %s1318_s7, %s726_s30 }
  0x5c   : > { %v348_v3 = vld [vmem:[%s340_s23] sm:$0xff]  ;;  %s1239_s11 = scalar_lea.hbm %s1316_s5, %s734_s19  ;;  %s551_s16 = sshll.u32 %s323_s22, 4  ;;  %s552_s16 = int_to_ptr.vmem [resolvable:$true] %s551_s16 }
  0x5d   : > { %748 = vmatmul.mubr.msk.f32.vlgmr.msra.gmra.mrb[0].mxu0 %vm357_vm1, %v348_v3  ;;  %vm436_vm4 = vcmp.ne.s32.totalorder %v435_v13, 0  ;;  %s529_s23 = scalar_lea.sflag [#allocation4], %s1186_s10  ;;  %s893_s29 = scalar_lea.vmem %s552_s16, 128 }
  0x5e   : > { %766 = vmatpush3.bf16.msra.mxu1 %v765_v9  ;;  %v730_v14 = vsel %vm436_vm4, 1.0, %v999_v0  ;;  %p894_p9 = scmp.ne.s32.totalorder %s552_s16, %s893_s29  ;;  %s1003_s9 = smov [#allocation7]  }
  0x5f   : > { %v440_v15 = vsel %vm439_vm3, %v730_v14, 0.0  ;;  %s897_s30 = sshll.u32 %s1003_s9, 4  ;;  %s898_s30 = int_to_ptr.vmem [resolvable:$false] %s897_s30 }
  0x60   : > { %441 = vadd.xlane.f32.xlu0 %v440_v15  ;;  %p895_p12 = pnand %p894_p9, %p1137_p8  ;;  %s899_s18 = scalar_lea.vmem %s898_s30, 256 }
  0x61   : > { %p900_p0 = scmp.lt.s32.totalorder %s552_s16, %s898_s30  ;;  %p901_p5 = scmp.lt.s32.totalorder %s899_s18, %s893_s29 }
  0x62   : > { %p896_p13 = pneg %p895_p12 }
  0x63   : > { %p902_p10 = por %p901_p5, %p900_p0 }
  0x65   : > { %p903_p1 = pnand %p902_p10, %p896_p13 }
  0xed   : > { %v442_v21 = vpop.xlane.xlu0 %441 }
  0xee   : > { %v443_v22 = vadd.f32 1.0, %v442_v21 }
  0xf0   : > { %833 = vrsqrt.f32 %v443_v22 }
  0xfa   : > { %v834_v23 = vpop.eup %833 }
  0xfb   : > { %527 = vst.msk [vmem:[%s344_s14] sm:$0xff] %vm526_vm6, %v834_v23 }
 0x130   : > { %v427_v17 = vpop.f32.mrb[0].mxu0 }
 0x131   : > { %v428_v18 = vadd.f32 %v728_v16, %v427_v17  ;;  %v749_v19 = vpop.f32.mrb[1].mxu0 }
 0x133   : > { %v431_v20 = vmax.f32 %v428_v18, 0.0 }
 0x135   : > { %759 = vmatmul.mubr.msk.f32.vlgmr.msra.gmra.mrb[0].mxu1 %vm449_vm5, %v431_v20  ;;  %523 = vst.msk [vmem:[%s323_s22] sm:$0xff] %vm449_vm5, %v431_v20 }
 0x136   : > { %906 = shalt.err (!%p903_p1)
}
 0x137   : > { %s907_s22 = scalar_lea.hbm %s1239_s11, 128  ;;  %s911_s20 = scalar_lea.hbm %s1316_s5, 256 }
 0x138   : > { %p908_p2 = scmp.ne.s32.totalorder %s1239_s11, %s907_s22  ;;  %p912_p4 = scmp.lt.u32.totalorder %s1239_s11, %s1316_s5 }
 0x139   : > { %p913_p11 = scmp.lt.u32.totalorder %s911_s20, %s907_s22  ;;  %p915_p9 = scmp.lt.u32.totalorder %s907_s22, %s1239_s11 }
 0x13a   : > { %p909_p7 = pnand %p908_p2, %p1137_p8 }
 0x13b   : > { %p914_p6 = por %p913_p11, %p912_p4 }
 0x13c   : > { %p910_p3 = pneg %p909_p7 }
 0x13d   : > { %p916_p12 = por %p915_p9, %p914_p6 }
 0x13f   : > { %p917_p13 = pnand %p916_p12, %p910_p3 }
 0x141   : > { %920 = shalt.err (!%p917_p13)
}
 0x142   : > { %773 = dma.vmem_to_hbm [thread:$0]  (%p1137_p8), %s552_s16, 128, %s1239_s11, %s529_s23  }
 0x143   : > { %s1338_s29 = sshll.u32 %s1186_s10, 3  ;;  %s1266_s14 = scalar_lea.hbm %s1317_s6, %s734_s19 }
 0x144   : > { %s330_s30 = scalar_lea.vmem [#allocation8], %s1338_s29  ;;  %s534_s11 = scalar_lea.sflag [#allocation9], %s1186_s10 }
 0x145   : > { %s564_s18 = sshll.u32 %s330_s30, 4  ;;  %s1004_s23 = smov [#allocation8]   ;;  %s1268_s18 = int_to_ptr.vmem [resolvable:$true] %s564_s18 }
 0x146   : > { %s921_s16 = scalar_lea.vmem %s1268_s18, 128  ;;  %s925_s28 = sshll.u32 %s1004_s23, 4  ;;  %s926_s28 = int_to_ptr.vmem [resolvable:$false] %s925_s28 }
 0x147   : > { %p922_p0 = scmp.ne.s32.totalorder %s1268_s18, %s921_s16  ;;  %s927_s20 = scalar_lea.vmem %s926_s28, 256 }
 0x148   : > { %p928_p1 = scmp.lt.s32.totalorder %s1268_s18, %s926_s28  ;;  %p929_p2 = scmp.lt.s32.totalorder %s927_s20, %s921_s16 }
 0x149   : > { %p923_p5 = pnand %p922_p0, %p1137_p8 }
 0x14a   : > { %p930_p7 = por %p929_p2, %p928_p1 }
 0x14b   : > { %p924_p10 = pneg %p923_p5 }
 0x14d   : > { %p931_p3 = pnand %p930_p7, %p924_p10 }
 0x208   : > { %v519_v24 = vpop.f32.mrb[0].mxu1 }
 0x209   : > { %v524_v25 = vmul.f32 %v834_v23, %v519_v24  ;;  %v760_v26 = vpop.f32.mrb[1].mxu1 }
 0x20b   : > { %525 = vst.msk [vmem:[%s330_s30] sm:$0xff] %vm449_vm5, %v524_v25 }
 0x20c   : > { %934 = shalt.err (!%p931_p3)
}
 0x20d   : > { %s935_s10 = scalar_lea.hbm %s1266_s14, 128  ;;  %s939_s9 = scalar_lea.hbm %s1317_s6, 256 }
 0x20e   : > { %p936_p4 = scmp.ne.s32.totalorder %s1266_s14, %s935_s10  ;;  %p940_p9 = scmp.lt.u32.totalorder %s1266_s14, %s1317_s6 }
 0x20f   : > { %p941_p12 = scmp.lt.u32.totalorder %s939_s9, %s935_s10  ;;  %p943_p0 = scmp.lt.u32.totalorder %s935_s10, %s1266_s14 }
 0x210   : > { %p937_p11 = pnand %p936_p4, %p1137_p8 }
 0x211   : > { %p942_p13 = por %p941_p12, %p940_p9 }
 0x212   : > { %p938_p6 = pneg %p937_p11 }
 0x213   : > { %p944_p5 = por %p943_p0, %p942_p13 }
 0x215   : > { %p945_p10 = pnand %p944_p5, %p938_p6 }
 0x217   : > { %948 = shalt.err (!%p945_p10)
}
 0x218   : > { %774 = dma.vmem_to_hbm [thread:$0]  (%p1137_p8), %s1268_s18, 128, %s1266_s14, %s534_s11  }
 0x219 PF: > { %s579_s15 = sand.u32 1, %s983_s24   ;;  %p1339_p1 = scmp.ne.s32.totalorder %s1324_s8, 0 }
 0x21a   : > { %p1340_p2 = scmp.ge.s32.totalorder %s995_s27, 2  ;;  %s580_s22 = scalar_lea.sflag [#allocation4], %s579_s15 }
 0x21c   : > { %p786_p7 = pnand %p1340_p2, %p1339_p1 }
 0x21e   : > { %974 = dma.done.wait (!%p786_p7), %s580_s22, 128  }
 0x21f   : > { %976 = vsyncadd (!%p786_p7), %s580_s22, 4294967168  ;;  %s589_s16 = scalar_lea.sflag [#allocation9], %s579_s15 }
 0x220   : > { %978 = dma.done.wait (!%p786_p7), %s589_s16, 128  }
 0x221   : > { %980 = vsyncadd (!%p786_p7), %s589_s16, 4294967168  ;;  %p25_p8 = scmp.ge.s32.totalorder %s1093_s12, 4   ;;  %s1341_s24 = smov %s987_s25 }
 0x222   : > { %s1342_s25 = smov %s991_s26  ;;  %s1343_s26 = smov %s1129_s17 }
 0x223   : > { %s1344_s27 = smov %s1093_s12  ;;  %27 = sbr.rel (!%p25_p8) target bundleno = 8 (0x8), region = 121 }
 0x22a   :  { %601 = vsyncpa [#allocation3], 1 }
 0x22b   :  { %603 = vsyncpa [#allocation3 + $0x1], 1 }
 0x22c   :  { %604 = vsyncpa [#allocation6], 1 }
 0x22d   :  { %605 = vsyncpa [#allocation4], 1 }
 0x22e   :  { %607 = vsyncpa [#allocation4 + $0x1], 1 }
 0x22f   :  { %608 = vsyncpa [#allocation9], 1 }
 0x230   :  { %610 = vsyncpa [#allocation9 + $0x1], 1 }

</bundles_post_ra>
